<compile_context>
chip_gen: v5e
topology: v5e:2x2
jax: 0.10.0
libtpu: 0.0.40
codegen_flags: <defaults>
</compile_context>

<pallas_src>
import math

import jax
import jax.numpy as jnp
from jax.experimental import pallas as pl
from jax.experimental.pallas import tpu as pltpu


def _flatten_dma_kernel(x_hbm, o_hbm, sem):
    # Pure memory movement: one contiguous HBM -> HBM DMA of the whole array.
    cp = pltpu.make_async_copy(x_hbm, o_hbm, sem)
    cp.start()
    cp.wait()


def flatten_pallas(x: jax.Array) -> jax.Array:
    """Equivalent of torch `x.view(x.size(0), -1)` for an (N, ...) array."""
    n = x.shape[0]
    f = math.prod(x.shape[1:]) if x.ndim > 1 else 1
    dtype = x.dtype
    itemsize = jnp.dtype(dtype).itemsize

    # Metadata-only row-major reshape to the torch output shape (N, C*H*W).
    x2d = x.reshape(n, f)

    # Single HBM->HBM DMA copy; works for any (n, f), ragged or not, with zero
    # VMEM footprint and no grid / tiling machinery.
    out2d = pl.pallas_call(
        _flatten_dma_kernel,
        out_shape=jax.ShapeDtypeStruct((n, f), dtype),
        in_specs=[pl.BlockSpec(memory_space=pl.ANY)],
        out_specs=pl.BlockSpec(memory_space=pl.ANY),
        scratch_shapes=[pltpu.SemaphoreType.DMA(())],
        cost_estimate=pl.CostEstimate(
            flops=0,
            transcendentals=0,
            bytes_accessed=2 * n * f * itemsize,
        ),
    )(x2d)

    return out2d


if __name__ == "__main__":
    key = jax.random.PRNGKey(0)
    # Small NCHW input consistent with the module's forward: batch=2, C=4, H=W=16.
    x = jax.random.normal(key, (2, 4, 16, 16), dtype=jnp.float32)

    out = flatten_pallas(x)
    out = jax.block_until_ready(out)

    # Reference semantics: torch.view(N, -1) == row-major reshape to (N, C*H*W).
    ref = x.reshape(x.shape[0], -1)
    assert out.shape == ref.shape, (out.shape, ref.shape)
    assert out.dtype == ref.dtype, (out.dtype, ref.dtype)
    assert bool(jnp.array_equal(out, ref)), "Pallas flatten mismatch vs reference"

    print("KERNEL_OK")
</pallas_src>

<mosaic_0001>
module attributes {stable_mosaic.version = 11 : i64} {
  func.func @_flatten_dma_kernel(%arg0: memref<2x1024xf32, #tpu.memory_space<any>>, %arg1: memref<2x1024xf32, #tpu.memory_space<any>>, %arg2: memref<!tpu.dma_semaphore, #tpu.memory_space<semaphore_mem>>) attributes {dimension_semantics = [], scalar_prefetch = 0 : i64, scratch_operands = 1 : i64, tpu.core_type = #tpu.core_type<tc>} {
    tpu.enqueue_dma source(%arg0 : memref<2x1024xf32, #tpu.memory_space<any>>) target(%arg1 : memref<2x1024xf32, #tpu.memory_space<any>>) target_semaphore(%arg2 : memref<!tpu.dma_semaphore, #tpu.memory_space<semaphore_mem>>)
    tpu.wait_dma2 semaphore(%arg2 : memref<!tpu.dma_semaphore, #tpu.memory_space<semaphore_mem>>) src(%arg0 : memref<2x1024xf32, #tpu.memory_space<any>>) dst(%arg1 : memref<2x1024xf32, #tpu.memory_space<any>>)
    return
  }
}

</mosaic_0001>

<bundles_post_ra>
// kernel: tpu_custom_call.1
= control target key start
LH: loop header
LB: loop body
LE: loop exit
PB: predicated region body
PF: predicated region fallthrough
CT: control target
= control target key end

     0   :  { %s33_s12 = smov [#allocation2]   ;;  %s34_s13 = smov [#allocation3]   ;;  %s52_s0 = inlined_call_operand.hbm [shape: f32[2,1024], index: 0, kind: input, shape index: {}]   ;;  %s53_s1 = inlined_call_operand.hbm [shape: f32[2,1024], index: 1, kind: output, shape index: {}]  }
   0x1   :  { %s10_s8 = sshll.u32 %s52_s0, 4  ;;  %s12_s11 = sshll.u32 %s53_s1, 4  ;;  %s11_s8 = int_to_ptr.hbm [resolvable:$true] %s10_s8  ;;  %s13_s11 = int_to_ptr.hbm [resolvable:$true] %s12_s11 }
   0x2   :  { %s35_s14 = smov 0  }
   0x3   :  { %16 = dma.general %s11_s8, 256, %s13_s11, %s33_s12, %s34_s13, [#allocation4], %s35_s14, 0  }
   0x4   :  { %31 = dma.done.wait [#allocation2], 256 }
   0x5   :  { %32 = vsyncadd [#allocation2], 4294967040 }
   0x6   :  { %21 = vsyncmov [#allocation2] }
   0x9   :  { %s22_s15 = vpop.sfrf %21 }
   0xa   :  { %p27_p0 = scmp.ne.s32.totalorder %s22_s15, 0 }
   0xc   :  { %26 = shalt.err (%p27_p0)  }

</bundles_post_ra>
